<compile_context>
chip_gen: v7x
topology: tpu7x:2x2x1
jax: 0.10.0
libtpu: 0.0.40
codegen_flags: <defaults>
</compile_context>

<pallas_src>
import functools
import math

import jax
import jax.numpy as jnp
import numpy as np
from jax.experimental import pallas as pl
from jax.experimental.pallas import tpu as pltpu


def _pick_block(dim: int, target: int) -> int:
    """Tile size: `target` when it evenly divides `dim`, otherwise the full dim."""
    if dim >= target and dim % target == 0:
        return target
    return dim  # small or non-divisible dims: take the whole axis (no masking needed)


# ----------------------------- 1x1 conv kernels ------------------------------
def _conv1x1_nn_kernel(w_ref, b_ref, x_ref, o_ref):
    """out[c_out, n] = sum_ci w[c_out, ci] * x[ci, n] + b[c_out]  (NCL in/out)."""
    x = x_ref[0].astype(w_ref.dtype)                              # (C_in, tn)
    y = jnp.dot(w_ref[...], x, preferred_element_type=jnp.float32)  # (C_out, tn)
    y = y + b_ref[...]                                            # (C_out, 1) bcast
    o_ref[0] = y.astype(o_ref.dtype)


def conv1x1_nn(x, w, b, *, out_dtype, block_n=512):
    """nn.Conv1d(C, C, 1) equivalent.  x: (B, C_in, N) -> (B, C_out, N)."""
    B, C_in, N = x.shape
    C_out = w.shape[0]
    tn = _pick_block(N, block_n)
    return pl.pallas_call(
        _conv1x1_nn_kernel,
        out_shape=jax.ShapeDtypeStruct((B, C_out, N), out_dtype),
        grid=(B, N // tn),
        in_specs=[
            pl.BlockSpec((C_out, C_in), lambda i, n: (0, 0)),   # weight stays resident
            pl.BlockSpec((C_out, 1), lambda i, n: (0, 0)),
            pl.BlockSpec((1, C_in, tn), lambda i, n: (i, 0, n)),
        ],
        out_specs=pl.BlockSpec((1, C_out, tn), lambda i, n: (i, 0, n)),
        compiler_params=pltpu.CompilerParams(
            dimension_semantics=("parallel", "parallel")),
    )(w, b.reshape(C_out, 1).astype(jnp.float32), x)


def _conv1x1_nt_kernel(w_ref, b_ref, x_ref, o_ref):
    """Same conv, but input tile is (tn, C_in) -> uses MXU transpose_rhs form."""
    x = x_ref[0].astype(w_ref.dtype)                              # (tn, C_in)
    y = jax.lax.dot_general(w_ref[...], x, (((1,), (1,)), ((), ())),
                            preferred_element_type=jnp.float32)   # (C_out, tn)
    y = y + b_ref[...]
    o_ref[0] = y.astype(o_ref.dtype)


def conv1x1_nt(x, w, b, *, out_dtype, block_n=512):
    """1x1 conv consuming NLC layout.  x: (B, N, C_in) -> (B, C_out, N)."""
    B, N, C_in = x.shape
    C_out = w.shape[0]
    tn = _pick_block(N, block_n)
    return pl.pallas_call(
        _conv1x1_nt_kernel,
        out_shape=jax.ShapeDtypeStruct((B, C_out, N), out_dtype),
        grid=(B, N // tn),
        in_specs=[
            pl.BlockSpec((C_out, C_in), lambda i, n: (0, 0)),
            pl.BlockSpec((C_out, 1), lambda i, n: (0, 0)),
            pl.BlockSpec((1, tn, C_in), lambda i, n: (i, n, 0)),
        ],
        out_specs=pl.BlockSpec((1, C_out, tn), lambda i, n: (i, 0, n)),
        compiler_params=pltpu.CompilerParams(
            dimension_semantics=("parallel", "parallel")),
    )(w, b.reshape(C_out, 1).astype(jnp.float32), x)


# --------------------------- flash attention kernel ---------------------------
def _flash_attn_kernel(q_ref, k_ref, v_ref, o_ref, m_ref, l_ref, acc_ref,
                       *, approx_recip):
    # q_ref: (1, H, tq, D)  (already scaled by 1/sqrt(D), folded into Wq)
    # k_ref, v_ref: (1, H, D, tk)
    # o_ref: (1, tq, H*D)   (feature order h-major/d-minor == merge-conv columns)
    # scratch (f32): m_ref/l_ref (H, tq, 1), acc_ref (H, tq, D)
    ki = pl.program_id(2)
    num_heads = q_ref.shape[1]
    head_dim = q_ref.shape[3]

    @pl.when(ki == 0)
    def _init():
        m_ref[...] = jnp.full(m_ref.shape, -jnp.inf, dtype=m_ref.dtype)
        l_ref[...] = jnp.zeros(l_ref.shape, dtype=l_ref.dtype)
        acc_ref[...] = jnp.zeros(acc_ref.shape, dtype=acc_ref.dtype)

    # Static (unrolled) head loop: amortizes per-step overhead of the small-K
    # (K = head_dim) MXU matmuls across all heads of this batch element.
    for h in range(num_heads):
        q = q_ref[0, h]                    # (tq, D)
        k = k_ref[0, h]                    # (D, tk)
        v = v_ref[0, h]                    # (D, tk)

        # (tq, D) @ (D, tk): natural MXU form, no transpose.
        s = jnp.dot(q, k, preferred_element_type=jnp.float32)          # (tq, tk) f32

        m_prev = m_ref[h]                                               # (tq, 1)
        m_new = jnp.maximum(m_prev, jnp.max(s, axis=-1, keepdims=True))
        alpha = jnp.exp(m_prev - m_new)                                 # (tq, 1)
        p = jnp.exp(s - m_new)                                          # unnormalized

        l_ref[h] = alpha * l_ref[h] + jnp.sum(p, axis=-1, keepdims=True)
        # (tq, tk) x (D, tk) contracting last dims: MXU transpose_rhs form.
        pv = jax.lax.dot_general(p.astype(v.dtype), v,
                                 (((1,), (1,)), ((), ())),
                                 preferred_element_type=jnp.float32)    # (tq, D)
        acc_ref[h] = alpha * acc_ref[h] + pv
        m_ref[h] = m_new

    @pl.when(ki == pl.num_programs(2) - 1)
    def _finalize():
        for h in range(num_heads):
            # Deferred softmax normalization: one EUP reciprocal + D muls per query.
            inv_l = pl.reciprocal(l_ref[h], approx=approx_recip)        # (tq, 1)
            out = (acc_ref[h] * inv_l).astype(o_ref.dtype)              # (tq, D)
            o_ref[0, :, h * head_dim:(h + 1) * head_dim] = out


def flash_attention(q, k, v, *, block_q=256, block_k=512, approx_recip=True):
    """q: (B, H, Nq, D) pre-scaled; k, v: (B, H, D, M) -> out: (B, Nq, H*D)."""
    B, H, Nq, D = q.shape
    M = k.shape[-1]
    tq = _pick_block(Nq, block_q)
    tk = _pick_block(M, block_k)
    kernel = functools.partial(_flash_attn_kernel, approx_recip=approx_recip)
    return pl.pallas_call(
        kernel,
        out_shape=jax.ShapeDtypeStruct((B, Nq, H * D), q.dtype),
        grid=(B, Nq // tq, M // tk),                   # KV reduction axis last
        in_specs=[
            pl.BlockSpec((1, H, tq, D), lambda b, qi, ki: (b, 0, qi, 0)),
            pl.BlockSpec((1, H, D, tk), lambda b, qi, ki: (b, 0, 0, ki)),
            pl.BlockSpec((1, H, D, tk), lambda b, qi, ki: (b, 0, 0, ki)),
        ],
        out_specs=pl.BlockSpec((1, tq, H * D), lambda b, qi, ki: (b, qi, 0)),
        scratch_shapes=[
            pltpu.VMEM((H, tq, 1), jnp.float32),   # running row max
            pltpu.VMEM((H, tq, 1), jnp.float32),   # running softmax denominator
            pltpu.VMEM((H, tq, D), jnp.float32),   # unnormalized output accumulator
        ],
        compiler_params=pltpu.CompilerParams(
            dimension_semantics=("parallel", "parallel", "arbitrary"),
            vmem_limit_bytes=64 * 1024 * 1024),
    )(q, k, v)


# ------------------------------ module wrapper --------------------------------
class MultiHeadedAttentionPallas:
    """JAX/Pallas port of the PyTorch MultiHeadedAttention module (forward only)."""

    def __init__(self, num_heads: int, d_model: int, key,
                 compute_dtype=jnp.bfloat16, block_q=256, block_k=512, block_n=512):
        assert d_model % num_heads == 0
        self.num_heads = num_heads
        self.d_model = d_model
        self.dim = d_model // num_heads
        self.compute_dtype = compute_dtype
        self.block_q, self.block_k, self.block_n = block_q, block_k, block_n

        # Raw parameters, torch.nn.Conv1d(d_model, d_model, 1)-style uniform init.
        bound = 1.0 / math.sqrt(d_model)
        keys = jax.random.split(key, 8)

        def init_wb(kw, kb):
            w = jax.random.uniform(kw, (d_model, d_model), jnp.float32, -bound, bound)
            b = jax.random.uniform(kb, (d_model,), jnp.float32, -bound, bound)
            return w, b

        self.wq, self.bq = init_wb(keys[0], keys[1])
        self.wk, self.bk = init_wb(keys[2], keys[3])
        self.wv, self.bv = init_wb(keys[4], keys[5])
        self.wm, self.bm = init_wb(keys[6], keys[7])

        # Derived (permuted / scaled / cast) parameters.
        # Reference layout maps projection channel c = d*H + h; we reorder the
        # projection OUTPUT channels to c' = h*D + d so reshape(B, H, D, N) splits
        # heads with no transpose, and permute the merge-conv INPUT columns to
        # match so the merge is also transpose-free.
        H, D = num_heads, self.dim
        c_new = np.arange(d_model)
        perm = (c_new % D) * H + (c_new // D)          # perm[h*D + d] = d*H + h
        scale = 1.0 / math.sqrt(D)                     # folded into the q projection

        self.wq_p = (self.wq[perm, :] * scale).astype(compute_dtype)
        self.bq_p = self.bq[perm] * scale
        self.wk_p = self.wk[perm, :].astype(compute_dtype)
        self.bk_p = self.bk[perm]
        self.wv_p = self.wv[perm, :].astype(compute_dtype)
        self.bv_p = self.bv[perm]
        self.wm_p = self.wm[:, perm].astype(compute_dtype)
        self.bm_p = self.bm

    def __call__(self, query, key, value):
        # query: (B, d_model, Nq); key/value: (B, d_model, M) float32
        B = query.shape[0]
        H, D = self.num_heads, self.dim
        cdt = self.compute_dtype

        # 1x1 conv projections (outputs stored in compute dtype, channels already
        # head-major so the head split below is a pure, copy-free reshape).
        qp = conv1x1_nn(query, self.wq_p, self.bq_p, out_dtype=cdt, block_n=self.block_n)
        kp = conv1x1_nn(key, self.wk_p, self.bk_p, out_dtype=cdt, block_n=self.block_n)
        vp = conv1x1_nn(value, self.wv_p, self.bv_p, out_dtype=cdt, block_n=self.block_n)

        kh = kp.reshape(B, H, D, -1)                   # (B, H, D, M)
        vh = vp.reshape(B, H, D, -1)
        # Single remaining layout pass (q only): (B, H, D, Nq) -> (B, H, Nq, D),
        # which makes both attention matmuls MXU-native (no in-kernel transposes).
        qh = jnp.swapaxes(qp.reshape(B, H, D, -1), -1, -2)

        approx = bool(jnp.dtype(cdt) != jnp.dtype(jnp.float32))
        oh = flash_attention(qh, kh, vh, block_q=self.block_q, block_k=self.block_k,
                             approx_recip=approx)      # (B, Nq, d_model), head-major

        # Merge conv consumes the (B, N, C) layout directly (columns of wm permuted
        # to match); final output back in f32 NCL like the reference module.
        return conv1x1_nt(oh, self.wm_p, self.bm_p, out_dtype=jnp.float32,
                          block_n=self.block_n)


# ----------------------------- pure-JAX reference -----------------------------
def reference_forward(m, query, key, value):
    """Exact mirror of the PyTorch module, using the raw (unpermuted) f32 weights."""
    def conv(x, w, b):
        return jnp.einsum("oi,bin->bon", w, x) + b[None, :, None]

    B = query.shape[0]
    q = conv(query, m.wq, m.bq).reshape(B, m.dim, m.num_heads, -1)
    k = conv(key, m.wk, m.bk).reshape(B, m.dim, m.num_heads, -1)
    v = conv(value, m.wv, m.bv).reshape(B, m.dim, m.num_heads, -1)
    scores = jnp.einsum("bdhn,bdhm->bhnm", q, k) / math.sqrt(m.dim)
    prob = jax.nn.softmax(scores, axis=-1)
    x = jnp.einsum("bhnm,bdhm->bdhn", prob, v)
    return conv(x.reshape(B, m.d_model, -1), m.wm, m.bm)


# ------------------------------------ main -------------------------------------
if __name__ == "__main__":
    B, d_model, num_heads = 2, 32, 4
    Nq, Nkv = 8, 16                                   # cross-attention style lengths

    root = jax.random.PRNGKey(0)
    k_param, k_q, k_k, k_v = jax.random.split(root, 4)

    query = jax.random.normal(k_q, (B, d_model, Nq), jnp.float32)
    key = jax.random.normal(k_k, (B, d_model, Nkv), jnp.float32)
    value = jax.random.normal(k_v, (B, d_model, Nkv), jnp.float32)

    # 1) f32 compute path: validates the kernel logic (permutation folding,
    #    online softmax, deferred normalization) at tight tolerance.
    mod_f32 = MultiHeadedAttentionPallas(num_heads, d_model, k_param,
                                         compute_dtype=jnp.float32)
    out_f32 = jax.block_until_ready(mod_f32(query, key, value))
    ref = reference_forward(mod_f32, query, key, value)
    np.testing.assert_allclose(np.asarray(out_f32), np.asarray(ref),
                               rtol=1e-4, atol=1e-4)

    # 2) bf16 compute path (the performance configuration: bf16 MXU operands,
    #    f32 accumulation, f32 softmax) at bf16-appropriate tolerance.
    mod_bf16 = MultiHeadedAttentionPallas(num_heads, d_model, k_param,
                                          compute_dtype=jnp.bfloat16)
    out_bf16 = jax.block_until_ready(mod_bf16(query, key, value))
    np.testing.assert_allclose(np.asarray(out_bf16), np.asarray(ref),
                               rtol=7.5e-2, atol=7.5e-2)

    assert out_f32.shape == (B, d_model, Nq)
    assert out_bf16.shape == (B, d_model, Nq)
    print("KERNEL_OK")
</pallas_src>

<mosaic_0001>
module attributes {stable_mosaic.version = 11 : i64} {
  func.func @_conv1x1_nn_kernel(%arg0: i32, %arg1: i32, %arg2: memref<32x32xf32, #tpu.memory_space<vmem>>, %arg3: memref<32x1xf32, #tpu.memory_space<vmem>>, %arg4: memref<1x32x8xf32, #tpu.memory_space<vmem>>, %arg5: memref<1x32x8xf32, #tpu.memory_space<vmem>>) attributes {dimension_semantics = [#tpu.dimension_semantics<parallel>, #tpu.dimension_semantics<parallel>], iteration_bounds = array<i64: 2, 1>, scalar_prefetch = 0 : i64, scratch_operands = 0 : i64, tpu.core_type = #tpu.core_type<tc>, window_params = [{pipeline_mode = #tpu.pipeline_mode<synchronous>, transform_indices = @transform_0, window_bounds = array<i64: 32, 32>}, {pipeline_mode = #tpu.pipeline_mode<synchronous>, transform_indices = @transform_1, window_bounds = array<i64: 32, 1>}, {transform_indices = @transform_2, window_bounds = array<i64: 1, 32, 8>}, {transform_indices = @transform_3, window_bounds = array<i64: 1, 32, 8>}]} {
    %c0 = arith.constant 0 : index
    %c0_0 = arith.constant 0 : index
    %c0_1 = arith.constant 0 : index
    %0 = vector.load %arg4[%c0, %c0_0, %c0_1] : memref<1x32x8xf32, #tpu.memory_space<vmem>>, vector<1x32x8xf32>
    %1 = vector.shape_cast %0 : vector<1x32x8xf32> to vector<32x8xf32>
    %c0_2 = arith.constant 0 : index
    %c0_3 = arith.constant 0 : index
    %2 = vector.load %arg2[%c0_2, %c0_3] : memref<32x32xf32, #tpu.memory_space<vmem>>, vector<32x32xf32>
    %cst = arith.constant dense<0.000000e+00> : vector<32x8xf32>
    %3 = tpu.matmul %2, %1, %cst {dimension_numbers = #tpu.dot_dimension_numbers<[1], [0], [0], [1], [0, 0, 1, 1], [], []>} : vector<32x32xf32>, vector<32x8xf32>, vector<32x8xf32> -> vector<32x8xf32>
    %c0_4 = arith.constant 0 : index
    %c0_5 = arith.constant 0 : index
    %4 = vector.load %arg3[%c0_4, %c0_5] : memref<32x1xf32, #tpu.memory_space<vmem>>, vector<32x1xf32>
    %5 = vector.broadcast %4 : vector<32x1xf32> to vector<32x8xf32>
    %6 = arith.addf %3, %5 : vector<32x8xf32>
    %c0_6 = arith.constant 0 : index
    %c0_7 = arith.constant 0 : index
    %c0_8 = arith.constant 0 : index
    %7 = vector.load %arg5[%c0_6, %c0_7, %c0_8] : memref<1x32x8xf32, #tpu.memory_space<vmem>>, vector<1x32x8xf32>
    %8 = vector.shape_cast %7 : vector<1x32x8xf32> to vector<32x8xf32>
    %9 = vector.shape_cast %6 : vector<32x8xf32> to vector<1x32x8xf32>
    tpu.vector_store %arg5[%c0_6, %c0_7, %c0_8], %9 {strides = array<i32>} : memref<1x32x8xf32, #tpu.memory_space<vmem>>, vector<1x32x8xf32>,
    return
  }
  func.func @transform_0(%arg0: i32, %arg1: i32) -> (i32, i32) {
    %c0_i32 = arith.constant 0 : i32
    %c0_i32_0 = arith.constant 0 : i32
    %c0_i32_1 = arith.constant 0 : i32
    return %c0_i32, %c0_i32_0 : i32, i32
  }
  func.func @transform_1(%arg0: i32, %arg1: i32) -> (i32, i32) {
    %c0_i32 = arith.constant 0 : i32
    %c0_i32_0 = arith.constant 0 : i32
    %c0_i32_1 = arith.constant 0 : i32
    return %c0_i32, %c0_i32_0 : i32, i32
  }
  func.func @transform_2(%arg0: i32, %arg1: i32) -> (i32, i32, i32) {
    %c0_i32 = arith.constant 0 : i32
    %c0_i32_0 = arith.constant 0 : i32
    return %arg0, %c0_i32, %arg1 : i32, i32, i32
  }
  func.func @transform_3(%arg0: i32, %arg1: i32) -> (i32, i32, i32) {
    %c0_i32 = arith.constant 0 : i32
    %c0_i32_0 = arith.constant 0 : i32
    return %arg0, %c0_i32, %arg1 : i32, i32, i32
  }
}

</mosaic_0001>

<bundles_post_ra>
// kernel: tpu_custom_call.1
= control target key start
LH: loop header
LB: loop body
LE: loop exit
PB: predicated region body
PF: predicated region fallthrough
CT: control target
= control target key end

     0   :  { %s543_s12 = smov 0   ;;  %s545_s13 = smov 0   ;;  %s607_s0 = inlined_call_operand.vmem [shape: f32[32,32], index: 0, kind: input, shape index: {}]   ;;  %s608_s1 = inlined_call_operand.vmem [shape: f32[32,1], index: 1, kind: input, shape index: {}]   ;;  %s609_s2 = inlined_call_operand.vmem [shape: f32[2,32,8], index: 2, kind: input, shape index: {}]   ;;  %s610_s3 = inlined_call_operand.vmem [shape: f32[2,32,8], index: 3, kind: output, shape index: {}]  }
   0x1   :  { %s547_s14 = smov 0  }
   0x2 LB: > { %s25_s15 = sadd.s32 1, %s516_s13  ;;  %p424_p0 = scmp.ge.s32.totalorder %s520_s14, 1  ;;  %s520_s14 = sphi %s547_s14, %s13_s14   ;;  %s516_s13 = sphi %s545_s13, %s612_s13   ;;  %s512_s12 = sphi %s543_s12, %s611_s12  }
   0x3   : > { %p27_p1 = scmp.ge.s32.totalorder %s25_s15, 2  ;;  %p156_p2 = scmp.lt.s32.totalorder %s520_s14, 3 }
   0x5   : > { %s614_s15 = smov (%p27_p1, %s25_s15), 0  ;;  %p157_p3 = pnand %p424_p0, %p156_p2 }
   0x6   : > { %p186_p4 = scmp.lt.s32.totalorder (!%p157_p3), %s512_s12, 1  ;;  %v206_v0 = vld [vmem:[%s607_s0] sm:$0xff] (!%p157_p3)  ;;  %vm234_vm0 = vcmask (!%p157_p3), 261120   ;;  %v208_v1 = vld [vmem:[%s607_s0 + $0x10] sm:$0xff] (!%p157_p3)  ;;  %v522_v4 = vmov (!%p157_p3), 0   ;;  %v213_v5 = vld [vmem:[%s608_s1 + $0x18] sm:$0xff] (!%p157_p3) }
   0x7   : > { %160 = sbr.rel (%p157_p3) target bundleno = 244 (0xf4), region = 32  ;;  %453 = vmatprep.mubr.msk.f32.mxu0 (!%p157_p3), %vm234_vm0, %v206_v0  ;;  %456 = vmatprep.mubr.msk.f32.mxu1 (!%p157_p3), %vm234_vm0, %v208_v1  ;;  %v212_v2 = vld [vmem:[%s608_s1 + $0x10] sm:$0xff] (!%p157_p3)  ;;  %v210_v3 = vld [vmem:[%s608_s1] sm:$0xff] (!%p157_p3)  ;;  %v211_v6 = vld [vmem:[%s608_s1 + $0x8] sm:$0xff] (!%p157_p3)  ;;  %vm332_vm1 = vcmask (!%p157_p3), 64512  }
   0x8   : > { %497 = vset.pattern.permute.xlu1 (!%p157_p3), %v522_v4  ;;  %496 = vset.pattern.permute.xlu0 (!%p157_p3), %v522_v4  ;;  %v207_v13 = vld [vmem:[%s607_s0 + $0x8] sm:$0xff] (!%p157_p3)  ;;  %v209_v14 = vld [vmem:[%s607_s0 + $0x18] sm:$0xff] (!%p157_p3) }
   0x9   : > { %226 = vperm.xlu1 (!%p157_p3), %497, %v212_v2   ;;  %216 = vperm.xlu0 (!%p157_p3), %496, %v210_v3  }
   0xd   : > { %231 = vperm.xlu1 (!%p157_p3), %497, %v213_v5   ;;  %221 = vperm.xlu0 (!%p157_p3), %496, %v211_v6  }
   0xe   : > { %s616_s12 = smov (!%p186_p4, %s512_s12), 1 }
   0xf   : > { %s435_s24 = sshll.u32 %s616_s12, 5 }
  0x10   : > { %s193_s4 = scalar_lea.vmem %s609_s2, %s435_s24  ;;  %s201_s11 = scalar_lea.vmem %s610_s3, %s435_s24 }
  0x11   : > { %v202_v7 = vld [vmem:[%s193_s4] sm:$0xff]  ;;  %v203_v8 = vld [vmem:[%s193_s4 + $0x8] sm:$0xff]  ;;  %v204_v9 = vld [vmem:[%s193_s4 + $0x10] sm:$0xff] }
  0x12   : > { %v459_v10 = vpack.c.bf16 %v203_v8, %v202_v7  ;;  %v205_v11 = vld [vmem:[%s193_s4 + $0x18] sm:$0xff] }
  0x13   : > { %v463_v12 = vpack.c.bf16 %v205_v11, %v204_v9 }
  0x14   : > { %460 = vmatprep.subr.bf16.mxu0 %v459_v10  ;;  %467 = vmatprep.subr.bf16.mxu1 %v459_v10 }
  0x15   : > { %462 = vmatpush3.bf16.msra.mxu0 %v459_v10  ;;  %469 = vmatpush3.bf16.msra.mxu1 %v459_v10 }
  0x16   : > { %464 = vmatprep.subr.bf16.mxu0 %v463_v12  ;;  %468 = vmatprep.subr.bf16.mxu1 %v463_v12 }
  0x19   : > { %466 = vmatpush3.bf16.msra.mxu0 %v463_v12  ;;  %470 = vmatpush3.bf16.msra.mxu1 %v463_v12 }
  0x1c   : > { %454 = vmatmul.mubr.msk.f32.vlgmr.msra.gmra.mrb[0].mxu0 %vm234_vm0, %v207_v13  ;;  %457 = vmatmul.mubr.msk.f32.vlgmr.msra.gmra.mrb[0].mxu1 %vm234_vm0, %v209_v14 }
  0x88   : > { %v227_v15 = vpop.permute.xlu1 %226  ;;  %v217_v16 = vpop.permute.xlu0 %216 }
  0x8c   : > { %v232_v17 = vpop.permute.xlu1 %231  ;;  %v222_v18 = vpop.permute.xlu0 %221 }
  0xef   : > { %v455_v19 = vpop.f32.mrb[0].mxu0  ;;  %v458_v20 = vpop.f32.mrb[0].mxu1 }
  0xf0   : > { %v319_v21 = vadd.f32 %v455_v19, %v222_v18  ;;  %v329_v22 = vadd.f32 %v458_v20, %v232_v17  ;;  %v313_v23 = vpop.f32.mrb[1].mxu0  ;;  %v323_v24 = vpop.f32.mrb[1].mxu1 }
  0xf1   : > { %v314_v25 = vadd.f32 %v313_v23, %v217_v16  ;;  %v324_v26 = vadd.f32 %v323_v24, %v227_v15 }
  0xf2   : > { %334 = vst.msk [vmem:[%s201_s11 + $0x8] sm:$0xff] %vm332_vm1, %v319_v21  ;;  %336 = vst.msk [vmem:[%s201_s11 + $0x18] sm:$0xff] %vm332_vm1, %v329_v22 }
  0xf3   : > { %333 = vst.msk [vmem:[%s201_s11] sm:$0xff] %vm332_vm1, %v314_v25  ;;  %335 = vst.msk [vmem:[%s201_s11 + $0x10] sm:$0xff] %vm332_vm1, %v324_v26 }
  0xf4 PF: > { %s13_s14 = sadd.s32 1, %s520_s14   ;;  %s611_s12 = smov %s516_s13 }
  0xf5   : > { %p10_p5 = scmp.ge.s32.totalorder %s13_s14, 4   ;;  %s612_s13 = smov %s614_s15 }
  0xf7   :  { %12 = sbr.rel (!%p10_p5) target bundleno = 2 (0x2), region = 62 }

</bundles_post_ra>
